<compile_context>
chip_gen: v7x
topology: tpu7x:2x2x1
jax: 0.10.0
libtpu: 0.0.40
codegen_flags: <defaults>
</compile_context>

<pallas_src>
import math

import jax
import jax.numpy as jnp
from jax.experimental import pallas as pl
from jax.experimental.pallas import tpu as pltpu


def _mlp2_kernel(x_ref, w1_ref, b1_ref, w2_ref, b2_ref, w3_ref, b3_ref, o_ref):
    # x_ref: (tm, 784)   w1: (784,16) b1: (1,16)
    #                    w2: (16,64)  b2: (1,64)
    #                    w3: (64,10)  b3: (1,10)   o_ref: (tm, 10)
    h = jnp.dot(x_ref[...], w1_ref[...], preferred_element_type=jnp.float32)
    h = jnp.maximum(h + b1_ref[...], 0.0)                                        # fc1 + ReLU
    h = jnp.dot(h, w2_ref[...], preferred_element_type=jnp.float32) + b2_ref[...]  # fc2
    y = jnp.dot(h, w3_ref[...], preferred_element_type=jnp.float32) + b3_ref[...]  # fc10
    o_ref[...] = y.astype(o_ref.dtype)


def _round_up(x, m):
    return ((x + m - 1) // m) * m


def _choose_row_tile(B, tm_max):
    """Pick the batch row tile.

    - Small batches (B <= 256): one full-extent block (no (8,128) constraint
      when the block equals the array dim).
    - Larger batches: cap at tm_max, and guarantee at least 2 grid steps so the
      "parallel" axis can shard across both TensorCores on v7x.  Neutral on
      1-TC chips (per-step overhead ~0.35us is hidden under the multi-us DMA).
    """
    if B <= 256:
        return B
    tm = min(tm_max, _round_up(pl.cdiv(B, 2), 8))
    return max(tm, 8)


def mlp2_forward_pallas(params, x2d, *, tm_max=1024):
    """Fused fc1+ReLU+fc2+fc10 on row tiles of x2d: (B, 784) -> (B, 10)."""
    B, K = x2d.shape
    w1, b1 = params["fc1_w"], params["fc1_b"]
    w2, b2 = params["fc2_w"], params["fc2_b"]
    w3, b3 = params["fc10_w"], params["fc10_b"]
    H1, H2, N = w1.shape[1], w2.shape[1], w3.shape[1]
    assert K == w1.shape[0] and H1 == w2.shape[0] and H2 == w3.shape[0]

    tm = _choose_row_tile(B, tm_max)
    grid = (pl.cdiv(B, tm),)

    return pl.pallas_call(
        _mlp2_kernel,
        out_shape=jax.ShapeDtypeStruct((B, N), jnp.float32),
        grid_spec=pltpu.PrefetchScalarGridSpec(
            num_scalar_prefetch=0,
            grid=grid,
            in_specs=[
                pl.BlockSpec((tm, K), lambda i: (i, 0)),    # input row tile (HBM stream)
                pl.BlockSpec((K, H1), lambda i: (0, 0)),    # fc1 weight (VMEM-resident)
                pl.BlockSpec((1, H1), lambda i: (0, 0)),    # fc1 bias
                pl.BlockSpec((H1, H2), lambda i: (0, 0)),   # fc2 weight
                pl.BlockSpec((1, H2), lambda i: (0, 0)),    # fc2 bias
                pl.BlockSpec((H2, N), lambda i: (0, 0)),    # fc10 weight
                pl.BlockSpec((1, N), lambda i: (0, 0)),     # fc10 bias
            ],
            out_specs=pl.BlockSpec((tm, N), lambda i: (i, 0)),
        ),
        compiler_params=pltpu.CompilerParams(
            dimension_semantics=("parallel",),
            # Explicit headroom: ~11 MiB working set at tm=1024, but the v5e
            # default scoped limit is only 16 MiB and v7x has a 64 MiB part.
            vmem_limit_bytes=48 << 20,
        ),
    )(x2d, w1, b1.reshape(1, H1), w2, b2.reshape(1, H2), w3, b3.reshape(1, N))


def init_params(key):
    # PyTorch-like Linear init: U(-1/sqrt(fan_in), 1/sqrt(fan_in)); weights stored (in, out).
    def uniform(k, shape, bound):
        return jax.random.uniform(k, shape, jnp.float32, -bound, bound)

    keys = jax.random.split(key, 6)
    params = {}
    layer_defs = [("fc1", 784, 16), ("fc2", 16, 64), ("fc10", 64, 10)]
    for n, (name, fi, fo) in enumerate(layer_defs):
        bound = 1.0 / math.sqrt(fi)
        params[name + "_w"] = uniform(keys[2 * n], (fi, fo), bound)
        params[name + "_b"] = uniform(keys[2 * n + 1], (fo,), bound)
    return params


@jax.jit
def model_mlp2_forward(params, x):
    # Matches torch: x.view(-1, 784) then fc1 -> ReLU -> fc2 -> fc10 (no ReLU after fc2).
    x2d = x.reshape(-1, 784)
    return mlp2_forward_pallas(params, x2d)


def _reference(params, x):
    x2d = x.reshape(-1, 784)
    h = jnp.maximum(x2d @ params["fc1_w"] + params["fc1_b"], 0.0)
    h = h @ params["fc2_w"] + params["fc2_b"]
    return h @ params["fc10_w"] + params["fc10_b"]


if __name__ == "__main__":
    key = jax.random.PRNGKey(0)
    pkey, xkey, xkey2 = jax.random.split(key, 3)
    params = init_params(pkey)

    # Small MNIST-like batch: (8, 1, 28, 28) flattens to (8, 784) -> single full block.
    x = jax.random.normal(xkey, (8, 1, 28, 28), jnp.float32)
    out = jax.block_until_ready(model_mlp2_forward(params, x))
    assert out.shape == (8, 10) and out.dtype == jnp.float32
    assert jnp.allclose(out, _reference(params, x), atol=2e-5, rtol=1e-5)

    # Mid-size batch (B=600) exercises the multi-step grid path
    # (tm = round_up(cdiv(600,2), 8) = 304 -> grid=(2,), partial last tile).
    x_big = jax.random.normal(xkey2, (600, 1, 28, 28), jnp.float32)
    out_big = jax.block_until_ready(model_mlp2_forward(params, x_big))
    assert out_big.shape == (600, 10)
    assert jnp.allclose(out_big, _reference(params, x_big), atol=2e-5, rtol=1e-5)

    print("KERNEL_OK")
</pallas_src>

<mosaic_0001>
module attributes {stable_mosaic.version = 11 : i64} {
  func.func @_mlp2_kernel(%arg0: i32, %arg1: memref<8x784xf32, #tpu.memory_space<vmem>>, %arg2: memref<784x16xf32, #tpu.memory_space<vmem>>, %arg3: memref<1x16xf32, #tpu.memory_space<vmem>>, %arg4: memref<16x64xf32, #tpu.memory_space<vmem>>, %arg5: memref<1x64xf32, #tpu.memory_space<vmem>>, %arg6: memref<64x10xf32, #tpu.memory_space<vmem>>, %arg7: memref<1x10xf32, #tpu.memory_space<vmem>>, %arg8: memref<8x10xf32, #tpu.memory_space<vmem>>) attributes {dimension_semantics = [#tpu.dimension_semantics<parallel>], iteration_bounds = array<i64: 1>, scalar_prefetch = 0 : i64, scratch_operands = 0 : i64, tpu.core_type = #tpu.core_type<tc>, window_params = [{transform_indices = @transform_0, window_bounds = array<i64: 8, 784>}, {pipeline_mode = #tpu.pipeline_mode<synchronous>, transform_indices = @transform_1, window_bounds = array<i64: 784, 16>}, {pipeline_mode = #tpu.pipeline_mode<synchronous>, transform_indices = @transform_2, window_bounds = array<i64: 1, 16>}, {pipeline_mode = #tpu.pipeline_mode<synchronous>, transform_indices = @transform_3, window_bounds = array<i64: 16, 64>}, {pipeline_mode = #tpu.pipeline_mode<synchronous>, transform_indices = @transform_4, window_bounds = array<i64: 1, 64>}, {pipeline_mode = #tpu.pipeline_mode<synchronous>, transform_indices = @transform_5, window_bounds = array<i64: 64, 10>}, {pipeline_mode = #tpu.pipeline_mode<synchronous>, transform_indices = @transform_6, window_bounds = array<i64: 1, 10>}, {transform_indices = @transform_7, window_bounds = array<i64: 8, 10>}]} {
    %c0 = arith.constant 0 : index
    %c0_0 = arith.constant 0 : index
    %0 = vector.load %arg1[%c0, %c0_0] : memref<8x784xf32, #tpu.memory_space<vmem>>, vector<8x784xf32>
    %c0_1 = arith.constant 0 : index
    %c0_2 = arith.constant 0 : index
    %1 = vector.load %arg2[%c0_1, %c0_2] : memref<784x16xf32, #tpu.memory_space<vmem>>, vector<784x16xf32>
    %cst = arith.constant dense<0.000000e+00> : vector<8x16xf32>
    %2 = tpu.matmul %0, %1, %cst {dimension_numbers = #tpu.dot_dimension_numbers<[1], [0], [0], [1], [0, 0, 1, 1], [], []>} : vector<8x784xf32>, vector<784x16xf32>, vector<8x16xf32> -> vector<8x16xf32>
    %c0_3 = arith.constant 0 : index
    %c0_4 = arith.constant 0 : index
    %3 = vector.load %arg3[%c0_3, %c0_4] : memref<1x16xf32, #tpu.memory_space<vmem>>, vector<1x16xf32>
    %4 = vector.broadcast %3 : vector<1x16xf32> to vector<8x16xf32>
    %5 = arith.addf %2, %4 : vector<8x16xf32>
    %cst_5 = arith.constant 0.000000e+00 : f32
    %6 = vector.broadcast %cst_5 : f32 to vector<8x16xf32>
    %7 = arith.maximumf %5, %6 : vector<8x16xf32>
    %c0_6 = arith.constant 0 : index
    %c0_7 = arith.constant 0 : index
    %8 = vector.load %arg4[%c0_6, %c0_7] : memref<16x64xf32, #tpu.memory_space<vmem>>, vector<16x64xf32>
    %cst_8 = arith.constant dense<0.000000e+00> : vector<8x64xf32>
    %9 = tpu.matmul %7, %8, %cst_8 {dimension_numbers = #tpu.dot_dimension_numbers<[1], [0], [0], [1], [0, 0, 1, 1], [], []>} : vector<8x16xf32>, vector<16x64xf32>, vector<8x64xf32> -> vector<8x64xf32>
    %c0_9 = arith.constant 0 : index
    %c0_10 = arith.constant 0 : index
    %10 = vector.load %arg5[%c0_9, %c0_10] : memref<1x64xf32, #tpu.memory_space<vmem>>, vector<1x64xf32>
    %11 = vector.broadcast %10 : vector<1x64xf32> to vector<8x64xf32>
    %12 = arith.addf %9, %11 : vector<8x64xf32>
    %c0_11 = arith.constant 0 : index
    %c0_12 = arith.constant 0 : index
    %13 = vector.load %arg6[%c0_11, %c0_12] : memref<64x10xf32, #tpu.memory_space<vmem>>, vector<64x10xf32>
    %cst_13 = arith.constant dense<0.000000e+00> : vector<8x10xf32>
    %14 = tpu.matmul %12, %13, %cst_13 {dimension_numbers = #tpu.dot_dimension_numbers<[1], [0], [0], [1], [0, 0, 1, 1], [], []>} : vector<8x64xf32>, vector<64x10xf32>, vector<8x10xf32> -> vector<8x10xf32>
    %c0_14 = arith.constant 0 : index
    %c0_15 = arith.constant 0 : index
    %15 = vector.load %arg7[%c0_14, %c0_15] : memref<1x10xf32, #tpu.memory_space<vmem>>, vector<1x10xf32>
    %16 = vector.broadcast %15 : vector<1x10xf32> to vector<8x10xf32>
    %17 = arith.addf %14, %16 : vector<8x10xf32>
    %c0_16 = arith.constant 0 : index
    %c0_17 = arith.constant 0 : index
    %18 = vector.load %arg8[%c0_16, %c0_17] : memref<8x10xf32, #tpu.memory_space<vmem>>, vector<8x10xf32>
    tpu.vector_store %arg8[%c0_16, %c0_17], %17 {strides = array<i32>} : memref<8x10xf32, #tpu.memory_space<vmem>>, vector<8x10xf32>,
    return
  }
  func.func @transform_0(%arg0: i32) -> (i32, i32) {
    %c0_i32 = arith.constant 0 : i32
    %c0_i32_0 = arith.constant 0 : i32
    return %arg0, %c0_i32 : i32, i32
  }
  func.func @transform_1(%arg0: i32) -> (i32, i32) {
    %c0_i32 = arith.constant 0 : i32
    %c0_i32_0 = arith.constant 0 : i32
    %c0_i32_1 = arith.constant 0 : i32
    return %c0_i32, %c0_i32_0 : i32, i32
  }
  func.func @transform_2(%arg0: i32) -> (i32, i32) {
    %c0_i32 = arith.constant 0 : i32
    %c0_i32_0 = arith.constant 0 : i32
    %c0_i32_1 = arith.constant 0 : i32
    return %c0_i32, %c0_i32_0 : i32, i32
  }
  func.func @transform_3(%arg0: i32) -> (i32, i32) {
    %c0_i32 = arith.constant 0 : i32
    %c0_i32_0 = arith.constant 0 : i32
    %c0_i32_1 = arith.constant 0 : i32
    return %c0_i32, %c0_i32_0 : i32, i32
  }
  func.func @transform_4(%arg0: i32) -> (i32, i32) {
    %c0_i32 = arith.constant 0 : i32
    %c0_i32_0 = arith.constant 0 : i32
    %c0_i32_1 = arith.constant 0 : i32
    return %c0_i32, %c0_i32_0 : i32, i32
  }
  func.func @transform_5(%arg0: i32) -> (i32, i32) {
    %c0_i32 = arith.constant 0 : i32
    %c0_i32_0 = arith.constant 0 : i32
    %c0_i32_1 = arith.constant 0 : i32
    return %c0_i32, %c0_i32_0 : i32, i32
  }
  func.func @transform_6(%arg0: i32) -> (i32, i32) {
    %c0_i32 = arith.constant 0 : i32
    %c0_i32_0 = arith.constant 0 : i32
    %c0_i32_1 = arith.constant 0 : i32
    return %c0_i32, %c0_i32_0 : i32, i32
  }
  func.func @transform_7(%arg0: i32) -> (i32, i32) {
    %c0_i32 = arith.constant 0 : i32
    %c0_i32_0 = arith.constant 0 : i32
    return %arg0, %c0_i32 : i32, i32
  }
}

</mosaic_0001>

<bundles_post_ra>
// kernel: model_mlp2_forward.1
= control target key start
LH: loop header
LB: loop body
LE: loop exit
PB: predicated region body
PF: predicated region fallthrough
CT: control target
= control target key end

     0   :  { %s1336_s0 = inlined_call_operand.vmem [shape: f32[8,784], index: 0, kind: input, shape index: {}]   ;;  %s1337_s1 = inlined_call_operand.vmem [shape: f32[784,16], index: 1, kind: input, shape index: {}]   ;;  %s1338_s2 = inlined_call_operand.vmem [shape: f32[1,16], index: 2, kind: input, shape index: {}]   ;;  %s1339_s3 = inlined_call_operand.vmem [shape: f32[16,64], index: 3, kind: input, shape index: {}]   ;;  %s1340_s4 = inlined_call_operand.vmem [shape: f32[1,64], index: 4, kind: input, shape index: {}]   ;;  %s1341_s5 = inlined_call_operand.vmem [shape: f32[64,10], index: 5, kind: input, shape index: {}]   ;;  %s1342_s6 = inlined_call_operand.vmem [shape: f32[1,10], index: 6, kind: input, shape index: {}]   ;;  %s1343_s7 = inlined_call_operand.hbm [shape: f32[8,10], index: 7, kind: output, shape index: {}]  }
   0x1   :  { %v50_v0 = vld [vmem:[%s1337_s1 + $0x80] sm:$0xff]  ;;  %v51_v1 = vld [vmem:[%s1337_s1 + $0x88] sm:$0xff]  ;;  %v52_v11 = vld [vmem:[%s1337_s1 + $0x90] sm:$0xff] }
   0x2   :  { %v34_v2 = vld [vmem:[%s1337_s1] sm:$0xff]  ;;  %v770_v3 = vpack.c.bf16 %v51_v1, %v50_v0  ;;  %v35_v4 = vld [vmem:[%s1337_s1 + $0x8] sm:$0xff]  ;;  %v53_v13 = vld [vmem:[%s1337_s1 + $0x98] sm:$0xff] }
   0x3   :  { %v82_v5 = vld [vmem:[%s1337_s1 + $0x180] sm:$0xff]  ;;  %v83_v6 = vld [vmem:[%s1337_s1 + $0x188] sm:$0xff]  ;;  %v772_v7 = vpack.c.bf16 %v35_v4, %v34_v2  ;;  %v36_v14 = vld [vmem:[%s1337_s1 + $0x10] sm:$0xff]  ;;  %v774_v16 = vpack.c.bf16 %v53_v13, %v52_v11 }
   0x4   :  { %v802_v8 = vpack.c.bf16 %v83_v6, %v82_v5  ;;  %v66_v9 = vld [vmem:[%s1337_s1 + $0x100] sm:$0xff]  ;;  %v67_v10 = vld [vmem:[%s1337_s1 + $0x108] sm:$0xff]  ;;  %771 = vmatprep.subr.bf16.mxu0 %v770_v3  ;;  %v37_v15 = vld [vmem:[%s1337_s1 + $0x18] sm:$0xff] }
   0x5   :  { %v804_v12 = vpack.c.bf16 %v67_v10, %v66_v9  ;;  %773 = vmatpush3.bf16.msra.mxu0 %v772_v7  ;;  %v776_v17 = vpack.c.bf16 %v37_v15, %v36_v14  ;;  %v84_v18 = vld [vmem:[%s1337_s1 + $0x190] sm:$0xff]  ;;  %v85_v19 = vld [vmem:[%s1337_s1 + $0x198] sm:$0xff]  ;;  %v54_v23 = vld [vmem:[%s1337_s1 + $0xa0] sm:$0xff] }
   0x6   :  { %803 = vmatprep.subr.bf16.mxu1 %v802_v8  ;;  %v68_v20 = vld [vmem:[%s1337_s1 + $0x110] sm:$0xff]  ;;  %v806_v21 = vpack.c.bf16 %v85_v19, %v84_v18  ;;  %v69_v22 = vld [vmem:[%s1337_s1 + $0x118] sm:$0xff]  ;;  %v55_v24 = vld [vmem:[%s1337_s1 + $0xa8] sm:$0xff]  ;;  %775 = vmatprep.subr.bf16.mxu0 %v774_v16 }
   0x7   :  { %805 = vmatpush3.bf16.msra.mxu1 %v804_v12  ;;  %v808_v25 = vpack.c.bf16 %v69_v22, %v68_v20  ;;  %v778_v26 = vpack.c.bf16 %v55_v24, %v54_v23  ;;  %v38_v27 = vld [vmem:[%s1337_s1 + $0x20] sm:$0xff]  ;;  %v39_v28 = vld [vmem:[%s1337_s1 + $0x28] sm:$0xff]  ;;  %v56_v35 = vld [vmem:[%s1337_s1 + $0xb0] sm:$0xff] }
   0x8   :  { %v86_v29 = vld [vmem:[%s1337_s1 + $0x1a0] sm:$0xff]  ;;  %807 = vmatprep.subr.bf16.mxu1 %v806_v21  ;;  %v87_v30 = vld [vmem:[%s1337_s1 + $0x1a8] sm:$0xff]  ;;  %v780_v33 = vpack.c.bf16 %v39_v28, %v38_v27  ;;  %v57_v36 = vld [vmem:[%s1337_s1 + $0xb8] sm:$0xff] }
   0x9   :  { %v70_v31 = vld [vmem:[%s1337_s1 + $0x120] sm:$0xff]  ;;  %v71_v32 = vld [vmem:[%s1337_s1 + $0x128] sm:$0xff]  ;;  %777 = vmatpush3.bf16.msra.mxu0 %v776_v17  ;;  %v810_v34 = vpack.c.bf16 %v87_v30, %v86_v29  ;;  %v40_v37 = vld [vmem:[%s1337_s1 + $0x30] sm:$0xff]  ;;  %v782_v39 = vpack.c.bf16 %v57_v36, %v56_v35 }
   0xa   :  { %779 = vmatprep.subr.bf16.mxu0 %v778_v26  ;;  %v812_v38 = vpack.c.bf16 %v71_v32, %v70_v31  ;;  %v41_v40 = vld [vmem:[%s1337_s1 + $0x38] sm:$0xff]  ;;  %v88_v41 = vld [vmem:[%s1337_s1 + $0x1b0] sm:$0xff]  ;;  %v58_v46 = vld [vmem:[%s1337_s1 + $0xc0] sm:$0xff] }
   0xb   :  { %809 = vmatpush3.bf16.msra.mxu1 %v808_v25  ;;  %v89_v42 = vld [vmem:[%s1337_s1 + $0x1b8] sm:$0xff]  ;;  %v72_v44 = vld [vmem:[%s1337_s1 + $0x130] sm:$0xff]  ;;  %v59_v47 = vld [vmem:[%s1337_s1 + $0xc8] sm:$0xff]  ;;  %v784_v48 = vpack.c.bf16 %v41_v40, %v40_v37 }
   0xc   :  { %811 = vmatprep.subr.bf16.mxu1 %v810_v34  ;;  %v814_v43 = vpack.c.bf16 %v89_v42, %v88_v41  ;;  %v73_v45 = vld [vmem:[%s1337_s1 + $0x138] sm:$0xff]  ;;  %v90_v49 = vld [vmem:[%s1337_s1 + $0x1c0] sm:$0xff]  ;;  %v91_v50 = vld [vmem:[%s1337_s1 + $0x1c8] sm:$0xff]  ;;  %v786_v52 = vpack.c.bf16 %v59_v47, %v58_v46 }
   0xd   :  { %781 = vmatpush3.bf16.msra.mxu0 %v780_v33  ;;  %v816_v51 = vpack.c.bf16 %v73_v45, %v72_v44  ;;  %v42_v53 = vld [vmem:[%s1337_s1 + $0x40] sm:$0xff]  ;;  %v43_v54 = vld [vmem:[%s1337_s1 + $0x48] sm:$0xff]  ;;  %v818_v56 = vpack.c.bf16 %v91_v50, %v90_v49  ;;  %v60_v58 = vld [vmem:[%s1337_s1 + $0xd0] sm:$0xff]  ;;  %v912_v50 = vmov 0.0|0.0  }
   0xe   :  { %783 = vmatprep.subr.bf16.mxu0 %v782_v39  ;;  %v74_v55 = vld [vmem:[%s1337_s1 + $0x140] sm:$0xff]  ;;  %v75_v57 = vld [vmem:[%s1337_s1 + $0x148] sm:$0xff]  ;;  %v61_v59 = vld [vmem:[%s1337_s1 + $0xd8] sm:$0xff]  ;;  %v788_v62 = vpack.c.bf16 %v43_v54, %v42_v53 }
   0xf   :  { %813 = vmatpush3.bf16.msra.mxu1 %v812_v38  ;;  %v92_v60 = vld [vmem:[%s1337_s1 + $0x1d0] sm:$0xff]  ;;  %v93_v61 = vld [vmem:[%s1337_s1 + $0x1d8] sm:$0xff]  ;;  %v820_v63 = vpack.c.bf16 %v75_v57, %v74_v55  ;;  %v790_v0 = vpack.c.bf16 %v61_v59, %v60_v58  ;;  %v62_v6 = vld [vmem:[%s1337_s1 + $0xe0] sm:$0xff] }
  0x10   :  { %815 = vmatprep.subr.bf16.mxu1 %v814_v43  ;;  %v44_v1 = vld [vmem:[%s1337_s1 + $0x50] sm:$0xff]  ;;  %v45_v2 = vld [vmem:[%s1337_s1 + $0x58] sm:$0xff]  ;;  %v822_v4 = vpack.c.bf16 %v93_v61, %v92_v60  ;;  %v63_v7 = vld [vmem:[%s1337_s1 + $0xe8] sm:$0xff] }
  0x11   :  { %785 = vmatpush3.bf16.msra.mxu0 %v784_v48  ;;  %v76_v3 = vld [vmem:[%s1337_s1 + $0x150] sm:$0xff]  ;;  %v77_v5 = vld [vmem:[%s1337_s1 + $0x158] sm:$0xff]  ;;  %v94_v8 = vld [vmem:[%s1337_s1 + $0x1e0] sm:$0xff]  ;;  %v792_v10 = vpack.c.bf16 %v45_v2, %v44_v1  ;;  %v794_v14 = vpack.c.bf16 %v63_v7, %v62_v6 }
  0x12   :  { %787 = vmatprep.subr.bf16.mxu0 %v786_v52  ;;  %v95_v9 = vld [vmem:[%s1337_s1 + $0x1e8] sm:$0xff]  ;;  %v46_v11 = vld [vmem:[%s1337_s1 + $0x60] sm:$0xff]  ;;  %v824_v13 = vpack.c.bf16 %v77_v5, %v76_v3  ;;  %v64_v19 = vld [vmem:[%s1337_s1 + $0xf0] sm:$0xff] }
  0x13   :  { %817 = vmatpush3.bf16.msra.mxu1 %v816_v51  ;;  %v28_v12 = vld [vmem:[%s1336_s0 + $0x8] sm:$0xff]  ;;  %v78_v16 = vld [vmem:[%s1337_s1 + $0x160] sm:$0xff]  ;;  %v826_v18 = vpack.c.bf16 %v95_v9, %v94_v8  ;;  %v65_v20 = vld [vmem:[%s1337_s1 + $0xf8] sm:$0xff] }
  0x14   :  { %819 = vmatprep.subr.bf16.mxu1 %v818_v56  ;;  %v47_v15 = vld [vmem:[%s1337_s1 + $0x68] sm:$0xff]  ;;  %207 = vmatprep.mubr.f32.mxu0 %v28_v12  ;;  %v30_v21 = vld [vmem:[%s1336_s0 + $0x18] sm:$0xff]  ;;  %v96_v22 = vld [vmem:[%s1337_s1 + $0x1f0] sm:$0xff]  ;;  %v798_v26 = vpack.c.bf16 %v65_v20, %v64_v19 }
  0x15   :  { %789 = vmatpush3.bf16.msra.mxu0 %v788_v62  ;;  %v79_v17 = vld [vmem:[%s1337_s1 + $0x168] sm:$0xff]  ;;  %v97_v23 = vld [vmem:[%s1337_s1 + $0x1f8] sm:$0xff]  ;;  %277 = vmatprep.mubr.f32.mxu1 %v30_v21  ;;  %v796_v24 = vpack.c.bf16 %v47_v15, %v46_v11  ;;  %v48_v27 = vld [vmem:[%s1337_s1 + $0x70] sm:$0xff] }
  0x16   :  { %791 = vmatprep.subr.bf16.mxu0 %v790_v0  ;;  %v828_v25 = vpack.c.bf16 %v79_v17, %v78_v16  ;;  %v49_v28 = vld [vmem:[%s1337_s1 + $0x78] sm:$0xff]  ;;  %v80_v29 = vld [vmem:[%s1337_s1 + $0x170] sm:$0xff]  ;;  %v830_v30 = vpack.c.bf16 %v97_v23, %v96_v22  ;;  %v114_v32 = vld [vmem:[%s1337_s1 + $0x280] sm:$0xff] }
  0x17   :  { %821 = vmatpush3.bf16.msra.mxu1 %v820_v63  ;;  %v81_v31 = vld [vmem:[%s1337_s1 + $0x178] sm:$0xff]  ;;  %v115_v33 = vld [vmem:[%s1337_s1 + $0x288] sm:$0xff]  ;;  %v800_v34 = vpack.c.bf16 %v49_v28, %v48_v27  ;;  %v98_v37 = vld [vmem:[%s1337_s1 + $0x200] sm:$0xff] }
  0x18   :  { %823 = vmatprep.subr.bf16.mxu1 %v822_v4  ;;  %v832_v35 = vpack.c.bf16 %v81_v31, %v80_v29  ;;  %v834_v36 = vpack.c.bf16 %v115_v33, %v114_v32  ;;  %v99_v38 = vld [vmem:[%s1337_s1 + $0x208] sm:$0xff]  ;;  %v116_v39 = vld [vmem:[%s1337_s1 + $0x290] sm:$0xff]  ;;  %v117_v40 = vld [vmem:[%s1337_s1 + $0x298] sm:$0xff] }
  0x19   :  { %793 = vmatpush3.bf16.msra.mxu0 %v792_v10  ;;  %v27_v41 = vld [vmem:[%s1336_s0] sm:$0xff]  ;;  %v836_v42 = vpack.c.bf16 %v99_v38, %v98_v37  ;;  %v29_v43 = vld [vmem:[%s1336_s0 + $0x10] sm:$0xff]  ;;  %v838_v45 = vpack.c.bf16 %v117_v40, %v116_v39  ;;  %v101_v46 = vld [vmem:[%s1337_s1 + $0x218] sm:$0xff] }
  0x1a   :  { %795 = vmatprep.subr.bf16.mxu0 %v794_v14  ;;  %v100_v44 = vld [vmem:[%s1337_s1 + $0x210] sm:$0xff]  ;;  %v118_v47 = vld [vmem:[%s1337_s1 + $0x2a0] sm:$0xff]  ;;  %v119_v48 = vld [vmem:[%s1337_s1 + $0x2a8] sm:$0xff] }
  0x1b   :  { %825 = vmatpush3.bf16.msra.mxu1 %v824_v13  ;;  %v32_v49 = vld [vmem:[%s1336_s0 + $0x28] sm:$0xff]  ;;  %v130_v51 = vld [vmem:[%s1337_s1 + $0x300] sm:$0xff] }
  0x1c   :  { %827 = vmatprep.subr.bf16.mxu1 %v826_v18  ;;  %v131_v52 = vld [vmem:[%s1337_s1 + $0x308] sm:$0xff] }
  0x1d   :  { %797 = vmatpush3.bf16.msra.mxu0 %v796_v24  ;;  %v867_v53 = vpack.c.bf16 %v131_v52, %v130_v51 }
  0x1e   :  { %799 = vmatprep.subr.bf16.mxu0 %v798_v26 }
  0x1f   :  { %829 = vmatpush3.bf16.msra.mxu1 %v828_v25 }
  0x20   :  { %831 = vmatprep.subr.bf16.mxu1 %v830_v30 }
  0x21   :  { %801 = vmatpush3.bf16.msra.mxu0 %v800_v34 }
  0x22   :  { %835 = vmatprep.subr.bf16.mxu0 %v834_v36 }
  0x23   :  { %833 = vmatpush3.bf16.msra.mxu1 %v832_v35 }
  0x24   :  { %866 = vmatprep.subr.bf16.mxu1 %v912_v50  ;;  %208 = vmatmul.mubr.f32.vlgmr.msra.gmra.mrb[0].mxu0 %v27_v41 }
  0x25   :  { %12 = vsyncpa [#allocation3], 0  ;;  %837 = vmatpush3.bf16.msra.mxu0 %v836_v42  ;;  %v840_v54 = vpack.c.bf16 %v101_v46, %v100_v44  ;;  %v842_v55 = vpack.c.bf16 %v119_v48, %v118_v47  ;;  %v102_v56 = vld [vmem:[%s1337_s1 + $0x220] sm:$0xff]  ;;  %v103_v57 = vld [vmem:[%s1337_s1 + $0x228] sm:$0xff]  ;;  %347 = vmatprep.mubr.f32.mxu0 %v32_v49  ;;  %vm913_vm0 = vmmov 0   ;;  %v914_v60 = vmov 0.0  }
  0x26   :  { %278 = vmatmul.mubr.f32.vlgmr.msra.gmra.mrb[0].mxu1 %v29_v43  ;;  %839 = vmatprep.subr.bf16.mxu0 %v838_v45  ;;  %v120_v58 = vld [vmem:[%s1337_s1 + $0x2b0] sm:$0xff]  ;;  %v121_v59 = vld [vmem:[%s1337_s1 + $0x2b8] sm:$0xff]  ;;  %vm139_vm1 = vcmask 130048   ;;  %v844_v62 = vpack.c.bf16 %v103_v57, %v102_v56  ;;  %v122_v2 = vld [vmem:[%s1337_s1 + $0x2c0] sm:$0xff]  ;;  %vm521_vm2 = vcmask 523264   ;;  %s915_s26 = smov [#allocation2]  }
  0x27   :  { %868 = vmatpush3.bf16.msra.mxu1 %v867_v53  ;;  %741 = vmatprep.mubr.msk.f32.mxu1 %vm913_vm0, %v914_v60  ;;  %v33_v61 = vld [vmem:[%s1336_s0 + $0x30] sm:$0xff]  ;;  %v846_v63 = vpack.c.bf16 %v121_v59, %v120_v58  ;;  %v105_v1 = vld [vmem:[%s1337_s1 + $0x238] sm:$0xff]  ;;  %v123_v3 = vld [vmem:[%s1337_s1 + $0x2c8] sm:$0xff]  ;;  %s603_s27 = sshll.u32 %s915_s26, 4  ;;  %vm595_vm3 = vcmask 80896   ;;  %s604_s27 = int_to_ptr.vmem [resolvable:$true] %s603_s27 }
  0x28   :  { %869 = vmatprep.subr.bf16.mxu1 %v912_v50  ;;  %v104_v0 = vld [vmem:[%s1337_s1 + $0x230] sm:$0xff]  ;;  %v850_v5 = vpack.c.bf16 %v123_v3, %v122_v2  ;;  %v106_v6 = vld [vmem:[%s1337_s1 + $0x240] sm:$0xff]  ;;  %v107_v7 = vld [vmem:[%s1337_s1 + $0x248] sm:$0xff]  ;;  %p893_p1 = scmp.lt.s32.totalorder %s604_s27, %s604_s27 }
  0x29   :  { %841 = vmatpush3.bf16.msra.mxu0 %v840_v54  ;;  %v848_v4 = vpack.c.bf16 %v105_v1, %v104_v0  ;;  %v124_v8 = vld [vmem:[%s1337_s1 + $0x2d0] sm:$0xff]  ;;  %v125_v9 = vld [vmem:[%s1337_s1 + $0x2d8] sm:$0xff]  ;;  %v852_v10 = vpack.c.bf16 %v107_v7, %v106_v6  ;;  %v126_v14 = vld [vmem:[%s1337_s1 + $0x2e0] sm:$0xff] }
  0x2a   :  { %843 = vmatprep.subr.bf16.mxu0 %v842_v55  ;;  %742 = vmatmul.mubr.msk.f32.vlgmr.msra.gmra.mrb[2].mxu1 %vm139_vm1, %v33_v61  ;;  %v854_v11 = vpack.c.bf16 %v125_v9, %v124_v8  ;;  %v108_v12 = vld [vmem:[%s1337_s1 + $0x250] sm:$0xff]  ;;  %v109_v13 = vld [vmem:[%s1337_s1 + $0x258] sm:$0xff]  ;;  %v127_v15 = vld [vmem:[%s1337_s1 + $0x2e8] sm:$0xff] }
  0x2b   :  { %748 = vmatprep.mubr.msk.f32.mxu1 %vm913_vm0, %v914_v60  ;;  %v856_v16 = vpack.c.bf16 %v109_v13, %v108_v12  ;;  %v858_v17 = vpack.c.bf16 %v127_v15, %v126_v14  ;;  %v110_v18 = vld [vmem:[%s1337_s1 + $0x260] sm:$0xff]  ;;  %v111_v19 = vld [vmem:[%s1337_s1 + $0x268] sm:$0xff]  ;;  %v128_v20 = vld [vmem:[%s1337_s1 + $0x2f0] sm:$0xff] }
  0x2c   :  { %v129_v21 = vld [vmem:[%s1337_s1 + $0x2f8] sm:$0xff]  ;;  %v860_v22 = vpack.c.bf16 %v111_v19, %v110_v18  ;;  %v112_v24 = vld [vmem:[%s1337_s1 + $0x270] sm:$0xff]  ;;  %v31_v27 = vld [vmem:[%s1336_s0 + $0x20] sm:$0xff] }
  0x2d   :  { %845 = vmatpush3.bf16.msra.mxu0 %v844_v62  ;;  %v862_v23 = vpack.c.bf16 %v129_v21, %v128_v20  ;;  %v113_v25 = vld [vmem:[%s1337_s1 + $0x278] sm:$0xff]  ;;  %v424_v28 = vld [vmem:[%s1339_s3] sm:$0xff]  ;;  %v425_v29 = vld [vmem:[%s1339_s3 + $0x8] sm:$0xff] }
  0x2e   :  { %847 = vmatprep.subr.bf16.mxu0 %v846_v63  ;;  %v864_v26 = vpack.c.bf16 %v113_v25, %v112_v24  ;;  %v870_v30 = vpack.c.bf16 %v425_v29, %v424_v28  ;;  %v611_v32 = vld [vmem:[%s1338_s2] ss:$0 sm:$0xff]  ;;  %v507_v47 = vld [vmem:[%s1341_s5 + $0x8] sm:$0xff]  ;;  %v508_v52 = vld [vmem:[%s1341_s5 + $0x10] sm:$0xff] }
  0x2f   :  { %v506_v46 = vld [vmem:[%s1341_s5] sm:$0xff]  ;;  %v509_v53 = vld [vmem:[%s1341_s5 + $0x18] sm:$0xff]  ;;  %v511_v56 = vld [vmem:[%s1341_s5 + $0x28] sm:$0xff] }
  0x30   :  { %871 = vmatpush3.bf16.msra.mxu1 %v870_v30  ;;  %v873_v49 = vpack.c.bf16 %v507_v47, %v506_v46  ;;  %v876_v54 = vpack.c.bf16 %v509_v53, %v508_v52  ;;  %v510_v55 = vld [vmem:[%s1341_s5 + $0x20] sm:$0xff]  ;;  %v512_v58 = vld [vmem:[%s1341_s5 + $0x30] sm:$0xff]  ;;  %v513_v59 = vld [vmem:[%s1341_s5 + $0x38] sm:$0xff]  ;;  %s888_s5 = scalar_lea.vmem %s604_s27, 128 }
  0x31   :  { %849 = vmatpush3.bf16.msra.mxu0 %v848_v4  ;;  %872 = vmatprep.subr.bf16.mxu1 %v912_v50  ;;  %v879_v57 = vpack.c.bf16 %v511_v56, %v510_v55  ;;  %v613_v61 = vld [vmem:[%s1340_s4] ss:$0 sm:$0xff]  ;;  %p889_p0 = scmp.ne.s32.totalorder %s604_s27, %s888_s5  ;;  %p894_p2 = scmp.lt.s32.totalorder %s888_s5, %s888_s5 }
  0x32   :  { %851 = vmatprep.subr.bf16.mxu0 %v850_v5 }
  0x33   :  { %p895_p3 = por %p894_p2, %p893_p1 }
  0x35   :  { %853 = vmatpush3.bf16.msra.mxu0 %v852_v10  ;;  %p896_p4 = pnand %p895_p3, %p889_p0 }
  0x36   :  { %855 = vmatprep.subr.bf16.mxu0 %v854_v11 }
  0x39   :  { %857 = vmatpush3.bf16.msra.mxu0 %v856_v16 }
  0x3a   :  { %859 = vmatprep.subr.bf16.mxu0 %v858_v17 }
  0x3d   :  { %861 = vmatpush3.bf16.msra.mxu0 %v860_v22 }
  0x3e   :  { %863 = vmatprep.subr.bf16.mxu0 %v862_v23 }
  0x41   :  { %865 = vmatpush3.bf16.msra.mxu0 %v864_v26 }
  0x44   :  { %348 = vmatmul.mubr.f32.vlgmr.msra.gmra.mrb[2].mxu0 %v31_v27 }
  0xf7   :  { %v649_v31 = vpop.f32.mrb[0].mxu0 }
  0xf8   :  { %v650_v33 = vpop.f32.mrb[1].mxu0 }
  0xf9   :  { %v684_v34 = vpop.f32.mrb[0].mxu1  ;;  %v651_v35 = vadd.f32 %v650_v33, %v649_v31 }
  0xfa   :  { %v685_v36 = vpop.f32.mrb[1].mxu1 }
  0xfb   :  { %v686_v37 = vadd.f32 %v685_v36, %v684_v34  ;;  %v210_v38 = vadd.f32 %v651_v35, %v611_v32 }
  0xfd   :  { %v280_v39 = vadd.f32 %v686_v37, %v210_v38  ;;  %v419_v40 = vpop.f32.mrb[2].mxu1 }
  0xfe   :  { %v743_v41 = vpop.f32.mrb[3].mxu1 }
 0x117   :  { %v719_v42 = vpop.f32.mrb[2].mxu0 }
 0x118   :  { %v720_v43 = vpop.f32.mrb[3].mxu0 }
 0x119   :  { %v721_v44 = vadd.f32 %v720_v43, %v719_v42 }
 0x11b   :  { %v350_v45 = vadd.f32 %v721_v44, %v280_v39 }
 0x11d   :  { %v420_v48 = vadd.f32 %v419_v40, %v350_v45 }
 0x11f   :  { %v423_v51 = vmax.f32 %v420_v48, 0.0 }
 0x121   :  { %749 = vmatmul.mubr.msk.f32.vlgmr.msra.gmra.mrb[4].mxu1 %vm139_vm1, %v423_v51 }
 0x122   :  { %874 = vmatpush3.bf16.msra.mxu1 %v873_v49  ;;  %767 = vmatprep.mubr.msk.f32.mxu1 %vm913_vm0, %v914_v60  ;;  %v882_v60 = vpack.c.bf16 %v513_v59, %v512_v58 }
 0x123   :  { %875 = vmatprep.subr.bf16.mxu1 %v912_v50 }
 0x126   :  { %877 = vmatpush3.bf16.msra.mxu1 %v876_v54 }
 0x127   :  { %878 = vmatprep.subr.bf16.mxu1 %v912_v50 }
 0x12a   :  { %880 = vmatpush3.bf16.msra.mxu1 %v879_v57 }
 0x12b   :  { %881 = vmatprep.subr.bf16.mxu1 %v912_v50  ;;  %v615_v50 = vld [vmem:[%s1342_s6] ss:$0 sm:$0xff] }
 0x12e   :  { %883 = vmatpush3.bf16.msra.mxu1 %v882_v60 }
 0x1f4   :  { %v502_v62 = vpop.f32.mrb[4].mxu1 }
 0x1f5   :  { %v503_v63 = vadd.f32 %v613_v61, %v502_v62  ;;  %v750_v0 = vpop.f32.mrb[5].mxu1 }
 0x1f7   :  { %768 = vmatmul.mubr.msk.f32.vlgmr.msra.gmra.mrb[6].mxu1 %vm521_vm2, %v503_v63 }
 0x2ca   :  { %v591_v1 = vpop.f32.mrb[6].mxu1 }
 0x2cb   :  { %v592_v2 = vadd.f32 %v615_v50, %v591_v1  ;;  %v769_v3 = vpop.f32.mrb[7].mxu1 }
 0x2cd   :  { %596 = vst.msk [vmem:[#allocation2] sm:$0xff] %vm595_vm3, %v592_v2 }
 0x2ce   :  { %899 = shalt.err (!%p896_p4)
}
 0x2cf   :  { %s900_s29 = scalar_lea.hbm %s1343_s7, 128 }
 0x2d0   :  { %p901_p5 = scmp.ne.s32.totalorder %s1343_s7, %s900_s29  ;;  %p904_p6 = scmp.lt.u32.totalorder %s900_s29, %s1343_s7 }
 0x2d2   :  { %p906_p7 = pnand %p904_p6, %p901_p5 }
 0x2d4   :  { %909 = shalt.err (!%p906_p7)
}
 0x2d5   :  { %606 = dma.vmem_to_hbm [thread:$0]  %s604_s27, 128, %s1343_s7, [#allocation3]  }
 0x2d6   :  { %910 = dma.done.wait [#allocation3], 128  }
 0x2d7   :  { %911 = vsyncadd [#allocation3], 4294967168 }
 0x2d8   :  { %610 = vsyncpa [#allocation3], 1 }

</bundles_post_ra>
